<compile_context>
chip_gen: v6e
topology: v6e:2x2x1
jax: 0.10.0
libtpu: 0.0.40
codegen_flags: <defaults>
</compile_context>

<pallas_src>
import math

import jax
import jax.numpy as jnp
import numpy as np
from jax import lax
from jax.experimental import pallas as pl
from jax.experimental.pallas import tpu as pltpu

# Problem sizes (consistent with the module's constructor).
B = 2            # batch
S = 8            # max_sequence_length
D = 32           # input_size
H = 2            # heads (outer attention)
KS = 4           # key_size (outer attention)
VS = 8           # value_size (outer attention)
SA_KS = 4        # self_attention_key_size (SelfAttention2, heads=1)
OUT = 2          # output_size

BS = B * S                 # flattened rows
SA_W = 2 * SA_KS + D       # packed [K|Q|V] projection width of one SA stage (40)
OUT_W = H + H * OUT        # packed [scores | folded value*lin1] width (6)
PROJ_ROWS = 40             # D weight rows + 1 bias row, padded to multiple of 8

# Row offsets inside the constants slab (all 8-row aligned).
R_BLK = 0                          # (BS, BS) block-diagonal SA mask
R_ONESB = ((BS + 7) // 8) * 8      # (B, BS) per-batch row-sum matrix
R_SUMH = R_ONESB + 8               # (H*OUT, OUT) head-sum matrix
R_BLF = R_SUMH + 8                 # (1, OUT) folded final bias
C_ROWS = R_BLF + 8
C_COLS = max(BS, OUT)


# ----------------------------------------------------------------------------
# Fused kernel: encoder x2 + outer attention + final linear, all batches,
# one grid step, 4 input DMAs.
# ----------------------------------------------------------------------------
def _fused_kernel(x_ref, m_ref, w_ref, c_ref, o_ref):
    # x_ref : (BS, D)              inputs, batch-major rows
    # m_ref : (BS, 1)              float mask (column layout)
    # w_ref : (3, PROJ_ROWS, SA_W) [stage1 | stage2 | outer] weights+bias rows
    # c_ref : (C_ROWS, C_COLS)     packed constants
    # o_ref : (B, OUT)
    mcol = m_ref[...]                                   # (BS, 1)
    c = c_ref[...]                                      # (C_ROWS, C_COLS)
    blk = c[R_BLK:R_BLK + BS, :BS]                      # (BS, BS) block-diag 0/1
    onesb = c[R_ONESB:R_ONESB + B, :BS]                 # (B, BS)  per-batch sums
    sumh = c[R_SUMH:R_SUMH + H * OUT, :OUT]             # (H*OUT, OUT)
    bl_f = c[R_BLF:R_BLF + 1, :OUT]                     # (1, OUT) folded bias

    def sa_stage(xf, idx):
        # One SelfAttention2 pass (heads=1), both batches in one matmul chain.
        wb = w_ref[idx]                                 # (PROJ_ROWS, SA_W)
        proj = (jnp.dot(xf, wb[:D, :], preferred_element_type=jnp.float32)
                + wb[D:D + 1, :])                       # (BS, SA_W)
        k = proj[:, :SA_KS]                             # pre-scaled keys
        q = proj[:, SA_KS:2 * SA_KS]
        v = proj[:, 2 * SA_KS:]
        # t[j, i] = <k_j, q_i>  (== scores[i, j] of the reference)
        t = lax.dot_general(k, q, (((1,), (1,)), ((), ())),
                            preferred_element_type=jnp.float32)   # (BS, BS)
        # blk zeroes cross-batch sigmoid terms before the t@V matmul;
        # column mask is folded into V, row mask applied to the result.
        t = jax.nn.sigmoid(t) * blk
        return mcol * jnp.dot(t, mcol * v, preferred_element_type=jnp.float32)

    enc = sa_stage(x_ref[...], 0)
    enc = sa_stage(enc, 1)

    # Outer attention, fully folded: cols [0:H] = raw head scores
    # (key proj folded with queries & 1/sqrt(KS)), cols [H:] = value proj
    # folded with lin1 weight (column order o*H + h).
    wb = w_ref[2]
    projo = (jnp.dot(enc, wb[:D, :OUT_W], preferred_element_type=jnp.float32)
             + wb[D:D + 1, :OUT_W])                     # (BS, OUT_W)
    sc = projo[:, :H] - 1.0e8 * (1.0 - mcol)            # additive mask broadcast
    z = projo[:, H:]                                    # (BS, H*OUT)

    # Numerically-safe softmax numerators: per-batch max over aligned 8-row
    # slices (S == f32 sublane group, so the slices are vreg-aligned).
    e_parts = []
    for bi in range(B):
        sb = sc[bi * S:(bi + 1) * S, :]
        e_parts.append(jnp.exp(sb - jnp.max(sb, axis=0, keepdims=True)))
    e = jnp.concatenate(e_parts, axis=0)                # (BS, H)

    # One matmul computes both the softmax denominators and the (unnormalized)
    # softmax-weighted sums of the folded value/lin1 projection.
    ez = jnp.concatenate([e] * OUT, axis=1) * z         # (BS, H*OUT)
    red = jnp.dot(onesb, jnp.concatenate([e, ez], axis=1),
                  preferred_element_type=jnp.float32)   # (B, H + H*OUT)
    denom = red[:, :H]                                  # (B, H)
    num = red[:, H:]                                    # (B, H*OUT)
    ratio = num / jnp.concatenate([denom] * OUT, axis=1)  # exact divide
    o_ref[...] = (jnp.dot(ratio, sumh, preferred_element_type=jnp.float32)
                  + bl_f)                               # (B, OUT)


def _full_spec(shape):
    return pl.BlockSpec(shape, lambda i, _n=len(shape): (0,) * _n)


def attention_module_forward(x, mask_u8, pp):
    """x: (B,S,D) float32, mask_u8: (B,S) uint8, pp: packed params dict."""
    assert mask_u8.dtype == jnp.uint8
    b, s, d = x.shape
    x2 = x.reshape(b * s, d)
    mcol = mask_u8.astype(jnp.float32).reshape(b * s, 1)   # only per-forward prep
    operands = (x2, mcol, pp["wstack"], pp["cslab"])
    return pl.pallas_call(
        _fused_kernel,
        out_shape=jax.ShapeDtypeStruct((b, OUT), jnp.float32),
        grid=(1,),
        in_specs=[_full_spec(op.shape) for op in operands],
        out_specs=_full_spec((b, OUT)),
        compiler_params=pltpu.CompilerParams(
            dimension_semantics=("arbitrary",),
            vmem_limit_bytes=2 * 1024 * 1024),
        cost_estimate=pl.CostEstimate(flops=131072, transcendentals=600,
                                      bytes_accessed=24640),
    )(*operands)


# ----------------------------------------------------------------------------
# Parameter init (raw, PyTorch-layout) and one-time packing for the kernel.
# ----------------------------------------------------------------------------
def _linear_init(key, out_f, in_f):
    kw, kb = jax.random.split(key)
    bound = 1.0 / math.sqrt(in_f)
    w = jax.random.uniform(kw, (out_f, in_f), jnp.float32, -bound, bound)
    b = jax.random.uniform(kb, (out_f,), jnp.float32, -bound, bound)
    return w, b


def init_params(key):
    keys = jax.random.split(key, 10)

    def sa_params(k0, k1, k2):
        wk, bk = _linear_init(k0, 1 * SA_KS, D)
        wq, bq = _linear_init(k1, 1 * SA_KS, D)
        wv, bv = _linear_init(k2, 1 * D, D)       # heads=1 -> value_size = D
        return (wk, bk, wq, bq, wv, bv)

    params = {
        "enc1": sa_params(keys[0], keys[1], keys[2]),
        "enc2": sa_params(keys[3], keys[4], keys[5]),
    }
    params["key_w"], params["key_b"] = _linear_init(keys[6], H * KS, D)
    params["value_w"], params["value_b"] = _linear_init(keys[7], H * VS, D)
    params["queries"] = jax.random.normal(keys[8], (H, KS), jnp.float32)
    params["lin1_w"], params["lin1_b"] = _linear_init(keys[9], OUT, H * VS)
    # NOTE: lin0/act0 and SelfAttention2.{bias,norm1,lin1,norm2} are dead code
    # in the reference forward and are intentionally not materialized.
    return params


def pack_params(p):
    """One-time fold / concat / pad of raw params into two kernel slabs."""
    sa_scale = math.sqrt(1.0 / SA_KS)
    head_scale = math.sqrt(1.0 / KS)

    def sa_slab(wk, bk, wq, bq, wv, bv):
        w = jnp.concatenate([wk.T * sa_scale, wq.T, wv.T], axis=1)   # (D, SA_W)
        b = jnp.concatenate([bk * sa_scale, bq, bv]).reshape(1, SA_W)
        slab = jnp.zeros((PROJ_ROWS, SA_W), jnp.float32)
        return slab.at[:D, :].set(w).at[D:D + 1, :].set(b)

    s1 = sa_slab(*p["enc1"])
    s2 = sa_slab(*p["enc2"])

    # Outer stage, fully folded at pack time.
    kw3 = p["key_w"].reshape(H, KS, D)
    wq_fold = head_scale * jnp.einsum("hkd,hk->dh", kw3, p["queries"])   # (D,H)
    cb = head_scale * jnp.einsum("hk,hk->h",
                                 p["key_b"].reshape(H, KS), p["queries"])
    vw3 = p["value_w"].reshape(H, VS, D)
    lw3 = p["lin1_w"].reshape(OUT, H, VS)
    wvl = jnp.einsum("hvd,ohv->doh", vw3, lw3).reshape(D, OUT * H)       # (D,H*OUT)
    bl_f = p["lin1_b"] + jnp.einsum("hv,ohv->o",
                                    p["value_b"].reshape(H, VS), lw3)    # (OUT,)

    wout = jnp.concatenate([wq_fold, wvl], axis=1)                       # (D, OUT_W)
    bo = jnp.concatenate([cb, jnp.zeros((OUT * H,), jnp.float32)]
                         ).reshape(1, OUT_W)
    s3 = jnp.zeros((PROJ_ROWS, SA_W), jnp.float32)
    s3 = s3.at[:D, :OUT_W].set(wout).at[D:D + 1, :OUT_W].set(bo)

    wstack = jnp.stack([s1, s2, s3])                                     # (3,40,40)

    # Constants slab: block-diag SA mask, per-batch row-sum, head-sum, bias.
    blk = jnp.kron(jnp.eye(B, dtype=jnp.float32),
                   jnp.ones((S, S), jnp.float32))                        # (BS,BS)
    onesb = jnp.kron(jnp.eye(B, dtype=jnp.float32),
                     jnp.ones((1, S), jnp.float32))                      # (B,BS)
    sumh = jnp.kron(jnp.eye(OUT, dtype=jnp.float32),
                    jnp.ones((H, 1), jnp.float32))                       # (H*OUT,OUT)
    cslab = jnp.zeros((C_ROWS, C_COLS), jnp.float32)
    cslab = cslab.at[R_BLK:R_BLK + BS, :BS].set(blk)
    cslab = cslab.at[R_ONESB:R_ONESB + B, :BS].set(onesb)
    cslab = cslab.at[R_SUMH:R_SUMH + H * OUT, :OUT].set(sumh)
    cslab = cslab.at[R_BLF:R_BLF + 1, :OUT].set(bl_f.reshape(1, OUT))

    return {"wstack": wstack, "cslab": cslab}


# ----------------------------------------------------------------------------
# Pure-JAX reference (mirrors the PyTorch math, highest matmul precision).
# ----------------------------------------------------------------------------
_PH = lax.Precision.HIGHEST


def _sa_ref(x, maskf, wk, bk, wq, bq, wv, bv, key_size):
    k = (jnp.einsum("bsd,od->bso", x, wk, precision=_PH) + bk) * math.sqrt(1.0 / key_size)
    q = jnp.einsum("bsd,od->bso", x, wq, precision=_PH) + bq
    v = jnp.einsum("bsd,od->bso", x, wv, precision=_PH) + bv
    s = jax.nn.sigmoid(jnp.einsum("bik,bjk->bij", q, k, precision=_PH))
    s = s * maskf[:, None, :] * maskf[:, :, None]
    return jnp.einsum("bij,bid->bjd", s, v, precision=_PH)


def _ref_forward(x, mask_u8, p):
    b, s, _ = x.shape
    maskf = mask_u8.astype(jnp.float32)
    enc = _sa_ref(x, maskf, *p["enc1"], key_size=SA_KS)
    enc = _sa_ref(enc, maskf, *p["enc2"], key_size=SA_KS)
    k = (jnp.einsum("bsd,od->bso", enc, p["key_w"], precision=_PH)
         + p["key_b"]).reshape(b, s, H, KS) * math.sqrt(1.0 / KS)
    v = (jnp.einsum("bsd,od->bso", enc, p["value_w"], precision=_PH)
         + p["value_b"]).reshape(b, s, H, VS)
    scores = jnp.einsum("bshk,hk->bsh", k, p["queries"], precision=_PH)
    scores = scores - 1.0e8 * (1.0 - maskf)[:, :, None]
    pr = jax.nn.softmax(scores, axis=1)
    attn = jnp.einsum("bsh,bshv->bhv", pr, v, precision=_PH).reshape(b, H * VS)
    return jnp.einsum("bv,ov->bo", attn, p["lin1_w"], precision=_PH) + p["lin1_b"]


if __name__ == "__main__":
    root = jax.random.PRNGKey(0)
    k_params, k_x = jax.random.split(root)
    raw_params = init_params(k_params)
    packed_params = pack_params(raw_params)   # packed once, reused every forward

    x = jax.random.normal(k_x, (B, S, D), jnp.float32)
    mask = jnp.ones((B, S), jnp.uint8).at[1, 5:].set(0)   # some padding in batch 1

    out = attention_module_forward(x, mask, packed_params)
    out = jax.block_until_ready(out)
    assert out.shape == (B, OUT) and out.dtype == jnp.float32

    ref = _ref_forward(x, mask, raw_params)
    np.testing.assert_allclose(np.asarray(out), np.asarray(ref),
                               rtol=1e-4, atol=1e-4)
    print("KERNEL_OK")
</pallas_src>

<mosaic_0001>
module attributes {stable_mosaic.version = 11 : i64} {
  func.func @_fused_kernel(%arg0: i32, %arg1: memref<16x32xf32, #tpu.memory_space<vmem>>, %arg2: memref<16x1xf32, #tpu.memory_space<vmem>>, %arg3: memref<3x40x40xf32, #tpu.memory_space<vmem>>, %arg4: memref<40x16xf32, #tpu.memory_space<vmem>>, %arg5: memref<2x2xf32, #tpu.memory_space<vmem>>) attributes {dimension_semantics = [#tpu.dimension_semantics<arbitrary>], iteration_bounds = array<i64: 1>, scalar_prefetch = 0 : i64, scratch_operands = 0 : i64, tpu.core_type = #tpu.core_type<tc>, window_params = [{pipeline_mode = #tpu.pipeline_mode<synchronous>, transform_indices = @transform_0, window_bounds = array<i64: 16, 32>}, {pipeline_mode = #tpu.pipeline_mode<synchronous>, transform_indices = @transform_1, window_bounds = array<i64: 16, 1>}, {pipeline_mode = #tpu.pipeline_mode<synchronous>, transform_indices = @transform_2, window_bounds = array<i64: 3, 40, 40>}, {pipeline_mode = #tpu.pipeline_mode<synchronous>, transform_indices = @transform_3, window_bounds = array<i64: 40, 16>}, {pipeline_mode = #tpu.pipeline_mode<synchronous>, transform_indices = @transform_4, window_bounds = array<i64: 2, 2>}]} {
    %c0 = arith.constant 0 : index
    %c0_0 = arith.constant 0 : index
    %0 = vector.load %arg2[%c0, %c0_0] : memref<16x1xf32, #tpu.memory_space<vmem>>, vector<16x1xf32>
    %c0_1 = arith.constant 0 : index
    %c0_2 = arith.constant 0 : index
    %1 = vector.load %arg4[%c0_1, %c0_2] : memref<40x16xf32, #tpu.memory_space<vmem>>, vector<40x16xf32>
    %2 = vector.extract_strided_slice %1 {offsets = [0, 0], sizes = [16, 16], strides = [1, 1]} : vector<40x16xf32> to vector<16x16xf32>
    %3 = vector.extract_strided_slice %1 {offsets = [16, 0], sizes = [2, 16], strides = [1, 1]} : vector<40x16xf32> to vector<2x16xf32>
    %4 = vector.extract_strided_slice %1 {offsets = [24, 0], sizes = [4, 2], strides = [1, 1]} : vector<40x16xf32> to vector<4x2xf32>
    %5 = vector.extract_strided_slice %1 {offsets = [32, 0], sizes = [1, 2], strides = [1, 1]} : vector<40x16xf32> to vector<1x2xf32>
    %c0_3 = arith.constant 0 : index
    %c0_4 = arith.constant 0 : index
    %6 = vector.load %arg1[%c0_3, %c0_4] : memref<16x32xf32, #tpu.memory_space<vmem>>, vector<16x32xf32>
    %c0_5 = arith.constant 0 : index
    %c0_6 = arith.constant 0 : index
    %c0_7 = arith.constant 0 : index
    %7 = vector.load %arg3[%c0_5, %c0_6, %c0_7] : memref<3x40x40xf32, #tpu.memory_space<vmem>>, vector<1x40x40xf32>
    %8 = vector.shape_cast %7 : vector<1x40x40xf32> to vector<40x40xf32>
    %9 = vector.extract_strided_slice %8 {offsets = [0, 0], sizes = [32, 40], strides = [1, 1]} : vector<40x40xf32> to vector<32x40xf32>
    %cst = arith.constant dense<0.000000e+00> : vector<16x40xf32>
    %10 = tpu.matmul %6, %9, %cst {dimension_numbers = #tpu.dot_dimension_numbers<[1], [0], [0], [1], [0, 0, 1, 1], [], []>} : vector<16x32xf32>, vector<32x40xf32>, vector<16x40xf32> -> vector<16x40xf32>
    %11 = vector.extract_strided_slice %8 {offsets = [32, 0], sizes = [1, 40], strides = [1, 1]} : vector<40x40xf32> to vector<1x40xf32>
    %12 = vector.broadcast %11 : vector<1x40xf32> to vector<16x40xf32>
    %13 = arith.addf %10, %12 : vector<16x40xf32>
    %14 = vector.extract_strided_slice %13 {offsets = [0, 0], sizes = [16, 4], strides = [1, 1]} : vector<16x40xf32> to vector<16x4xf32>
    %15 = vector.extract_strided_slice %13 {offsets = [0, 4], sizes = [16, 4], strides = [1, 1]} : vector<16x40xf32> to vector<16x4xf32>
    %16 = vector.extract_strided_slice %13 {offsets = [0, 8], sizes = [16, 32], strides = [1, 1]} : vector<16x40xf32> to vector<16x32xf32>
    %cst_8 = arith.constant dense<0.000000e+00> : vector<16x16xf32>
    %17 = tpu.matmul %14, %15, %cst_8 {dimension_numbers = #tpu.dot_dimension_numbers<[1], [1], [0], [0], [0, 0, 1, 0], [], []>} : vector<16x4xf32>, vector<16x4xf32>, vector<16x16xf32> -> vector<16x16xf32>
    %18 = arith.negf %17 : vector<16x16xf32>
    %19 = math.exp %18 : vector<16x16xf32>
    %cst_9 = arith.constant 1.000000e+00 : f32
    %20 = vector.broadcast %cst_9 : f32 to vector<16x16xf32>
    %21 = arith.addf %20, %19 : vector<16x16xf32>
    %22 = arith.divf %20, %21 : vector<16x16xf32>
    %23 = arith.mulf %22, %2 : vector<16x16xf32>
    %24 = vector.broadcast %0 : vector<16x1xf32> to vector<16x32xf32>
    %25 = arith.mulf %24, %16 : vector<16x32xf32>
    %cst_10 = arith.constant dense<0.000000e+00> : vector<16x32xf32>
    %26 = tpu.matmul %23, %25, %cst_10 {dimension_numbers = #tpu.dot_dimension_numbers<[1], [0], [0], [1], [0, 0, 1, 1], [], []>} : vector<16x16xf32>, vector<16x32xf32>, vector<16x32xf32> -> vector<16x32xf32>
    %27 = vector.broadcast %0 : vector<16x1xf32> to vector<16x32xf32>
    %28 = arith.mulf %27, %26 : vector<16x32xf32>
    %c1 = arith.constant 1 : index
    %c0_11 = arith.constant 0 : index
    %c0_12 = arith.constant 0 : index
    %29 = vector.load %arg3[%c1, %c0_11, %c0_12] : memref<3x40x40xf32, #tpu.memory_space<vmem>>, vector<1x40x40xf32>
    %30 = vector.shape_cast %29 : vector<1x40x40xf32> to vector<40x40xf32>
    %31 = vector.extract_strided_slice %30 {offsets = [0, 0], sizes = [32, 40], strides = [1, 1]} : vector<40x40xf32> to vector<32x40xf32>
    %cst_13 = arith.constant dense<0.000000e+00> : vector<16x40xf32>
    %32 = tpu.matmul %28, %31, %cst_13 {dimension_numbers = #tpu.dot_dimension_numbers<[1], [0], [0], [1], [0, 0, 1, 1], [], []>} : vector<16x32xf32>, vector<32x40xf32>, vector<16x40xf32> -> vector<16x40xf32>
    %33 = vector.extract_strided_slice %30 {offsets = [32, 0], sizes = [1, 40], strides = [1, 1]} : vector<40x40xf32> to vector<1x40xf32>
    %34 = vector.broadcast %33 : vector<1x40xf32> to vector<16x40xf32>
    %35 = arith.addf %32, %34 : vector<16x40xf32>
    %36 = vector.extract_strided_slice %35 {offsets = [0, 0], sizes = [16, 4], strides = [1, 1]} : vector<16x40xf32> to vector<16x4xf32>
    %37 = vector.extract_strided_slice %35 {offsets = [0, 4], sizes = [16, 4], strides = [1, 1]} : vector<16x40xf32> to vector<16x4xf32>
    %38 = vector.extract_strided_slice %35 {offsets = [0, 8], sizes = [16, 32], strides = [1, 1]} : vector<16x40xf32> to vector<16x32xf32>
    %cst_14 = arith.constant dense<0.000000e+00> : vector<16x16xf32>
    %39 = tpu.matmul %36, %37, %cst_14 {dimension_numbers = #tpu.dot_dimension_numbers<[1], [1], [0], [0], [0, 0, 1, 0], [], []>} : vector<16x4xf32>, vector<16x4xf32>, vector<16x16xf32> -> vector<16x16xf32>
    %40 = arith.negf %39 : vector<16x16xf32>
    %41 = math.exp %40 : vector<16x16xf32>
    %cst_15 = arith.constant 1.000000e+00 : f32
    %42 = vector.broadcast %cst_15 : f32 to vector<16x16xf32>
    %43 = arith.addf %42, %41 : vector<16x16xf32>
    %44 = arith.divf %42, %43 : vector<16x16xf32>
    %45 = arith.mulf %44, %2 : vector<16x16xf32>
    %46 = vector.broadcast %0 : vector<16x1xf32> to vector<16x32xf32>
    %47 = arith.mulf %46, %38 : vector<16x32xf32>
    %cst_16 = arith.constant dense<0.000000e+00> : vector<16x32xf32>
    %48 = tpu.matmul %45, %47, %cst_16 {dimension_numbers = #tpu.dot_dimension_numbers<[1], [0], [0], [1], [0, 0, 1, 1], [], []>} : vector<16x16xf32>, vector<16x32xf32>, vector<16x32xf32> -> vector<16x32xf32>
    %49 = vector.broadcast %0 : vector<16x1xf32> to vector<16x32xf32>
    %50 = arith.mulf %49, %48 : vector<16x32xf32>
    %c2 = arith.constant 2 : index
    %c0_17 = arith.constant 0 : index
    %c0_18 = arith.constant 0 : index
    %51 = vector.load %arg3[%c2, %c0_17, %c0_18] : memref<3x40x40xf32, #tpu.memory_space<vmem>>, vector<1x40x40xf32>
    %52 = vector.shape_cast %51 : vector<1x40x40xf32> to vector<40x40xf32>
    %53 = vector.extract_strided_slice %52 {offsets = [0, 0], sizes = [32, 6], strides = [1, 1]} : vector<40x40xf32> to vector<32x6xf32>
    %cst_19 = arith.constant dense<0.000000e+00> : vector<16x6xf32>
    %54 = tpu.matmul %50, %53, %cst_19 {dimension_numbers = #tpu.dot_dimension_numbers<[1], [0], [0], [1], [0, 0, 1, 1], [], []>} : vector<16x32xf32>, vector<32x6xf32>, vector<16x6xf32> -> vector<16x6xf32>
    %55 = vector.extract_strided_slice %52 {offsets = [32, 0], sizes = [1, 6], strides = [1, 1]} : vector<40x40xf32> to vector<1x6xf32>
    %56 = vector.broadcast %55 : vector<1x6xf32> to vector<16x6xf32>
    %57 = arith.addf %54, %56 : vector<16x6xf32>
    %58 = vector.extract_strided_slice %57 {offsets = [0, 0], sizes = [16, 2], strides = [1, 1]} : vector<16x6xf32> to vector<16x2xf32>
    %cst_20 = arith.constant 1.000000e+00 : f32
    %59 = vector.broadcast %cst_20 : f32 to vector<16x1xf32>
    %60 = arith.subf %59, %0 : vector<16x1xf32>
    %cst_21 = arith.constant 1.000000e+08 : f32
    %61 = vector.broadcast %cst_21 : f32 to vector<16x1xf32>
    %62 = arith.mulf %61, %60 : vector<16x1xf32>
    %63 = vector.broadcast %62 : vector<16x1xf32> to vector<16x2xf32>
    %64 = arith.subf %58, %63 : vector<16x2xf32>
    %65 = vector.extract_strided_slice %57 {offsets = [0, 2], sizes = [16, 4], strides = [1, 1]} : vector<16x6xf32> to vector<16x4xf32>
    %66 = vector.extract_strided_slice %64 {offsets = [0, 0], sizes = [8, 2], strides = [1, 1]} : vector<16x2xf32> to vector<8x2xf32>
    %cst_22 = arith.constant dense<0xFF800000> : vector<2xf32>
    %67 = vector.multi_reduction <maximumf>, %66, %cst_22 [0] : vector<8x2xf32> to vector<2xf32>
    %68 = vector.shape_cast %67 : vector<2xf32> to vector<1x2xf32>
    %69 = vector.broadcast %68 : vector<1x2xf32> to vector<8x2xf32>
    %70 = arith.subf %66, %69 : vector<8x2xf32>
    %71 = math.exp %70 : vector<8x2xf32>
    %72 = vector.extract_strided_slice %64 {offsets = [8, 0], sizes = [8, 2], strides = [1, 1]} : vector<16x2xf32> to vector<8x2xf32>
    %cst_23 = arith.constant dense<0xFF800000> : vector<2xf32>
    %73 = vector.multi_reduction <maximumf>, %72, %cst_23 [0] : vector<8x2xf32> to vector<2xf32>
    %74 = vector.shape_cast %73 : vector<2xf32> to vector<1x2xf32>
    %75 = vector.broadcast %74 : vector<1x2xf32> to vector<8x2xf32>
    %76 = arith.subf %72, %75 : vector<8x2xf32>
    %77 = math.exp %76 : vector<8x2xf32>
    %78 = tpu.concatenate %71, %77 in 0 : vector<8x2xf32>, vector<8x2xf32> -> vector<16x2xf32>
    %79 = tpu.concatenate %78, %78 in 1 : vector<16x2xf32>, vector<16x2xf32> -> vector<16x4xf32>
    %80 = arith.mulf %79, %65 : vector<16x4xf32>
    %81 = tpu.concatenate %78, %80 in 1 : vector<16x2xf32>, vector<16x4xf32> -> vector<16x6xf32>
    %cst_24 = arith.constant dense<0.000000e+00> : vector<2x6xf32>
    %82 = tpu.matmul %3, %81, %cst_24 {dimension_numbers = #tpu.dot_dimension_numbers<[1], [0], [0], [1], [0, 0, 1, 1], [], []>} : vector<2x16xf32>, vector<16x6xf32>, vector<2x6xf32> -> vector<2x6xf32>
    %83 = vector.extract_strided_slice %82 {offsets = [0, 0], sizes = [2, 2], strides = [1, 1]} : vector<2x6xf32> to vector<2x2xf32>
    %84 = vector.extract_strided_slice %82 {offsets = [0, 2], sizes = [2, 4], strides = [1, 1]} : vector<2x6xf32> to vector<2x4xf32>
    %85 = tpu.concatenate %83, %83 in 1 : vector<2x2xf32>, vector<2x2xf32> -> vector<2x4xf32>
    %86 = arith.divf %84, %85 : vector<2x4xf32>
    %cst_25 = arith.constant dense<0.000000e+00> : vector<2x2xf32>
    %87 = tpu.matmul %86, %4, %cst_25 {dimension_numbers = #tpu.dot_dimension_numbers<[1], [0], [0], [1], [0, 0, 1, 1], [], []>} : vector<2x4xf32>, vector<4x2xf32>, vector<2x2xf32> -> vector<2x2xf32>
    %88 = vector.broadcast %5 : vector<1x2xf32> to vector<2x2xf32>
    %89 = arith.addf %87, %88 : vector<2x2xf32>
    %c0_26 = arith.constant 0 : index
    %c0_27 = arith.constant 0 : index
    %90 = vector.load %arg5[%c0_26, %c0_27] : memref<2x2xf32, #tpu.memory_space<vmem>>, vector<2x2xf32>
    tpu.vector_store %arg5[%c0_26, %c0_27], %89 {strides = array<i32>} : memref<2x2xf32, #tpu.memory_space<vmem>>, vector<2x2xf32>,
    return
  }
  func.func @transform_0(%arg0: i32) -> (i32, i32) {
    %c0_i32 = arith.constant 0 : i32
    %c0_i32_0 = arith.constant 0 : i32
    %c0_i32_1 = arith.constant 0 : i32
    return %c0_i32, %c0_i32_0 : i32, i32
  }
  func.func @transform_1(%arg0: i32) -> (i32, i32) {
    %c0_i32 = arith.constant 0 : i32
    %c0_i32_0 = arith.constant 0 : i32
    %c0_i32_1 = arith.constant 0 : i32
    return %c0_i32, %c0_i32_0 : i32, i32
  }
  func.func @transform_2(%arg0: i32) -> (i32, i32, i32) {
    %c0_i32 = arith.constant 0 : i32
    %c0_i32_0 = arith.constant 0 : i32
    %c0_i32_1 = arith.constant 0 : i32
    %c0_i32_2 = arith.constant 0 : i32
    return %c0_i32, %c0_i32_0, %c0_i32_1 : i32, i32, i32
  }
  func.func @transform_3(%arg0: i32) -> (i32, i32) {
    %c0_i32 = arith.constant 0 : i32
    %c0_i32_0 = arith.constant 0 : i32
    %c0_i32_1 = arith.constant 0 : i32
    return %c0_i32, %c0_i32_0 : i32, i32
  }
  func.func @transform_4(%arg0: i32) -> (i32, i32) {
    %c0_i32 = arith.constant 0 : i32
    %c0_i32_0 = arith.constant 0 : i32
    %c0_i32_1 = arith.constant 0 : i32
    return %c0_i32, %c0_i32_0 : i32, i32
  }
}

</mosaic_0001>

<bundles_post_ra>
// kernel: tpu_custom_call.1
= control target key start
LH: loop header
LB: loop body
LE: loop exit
PB: predicated region body
PF: predicated region fallthrough
CT: control target
= control target key end

     0   :  { %9 = vsyncpa [#allocation3], 0  ;;  %s1338_s0 = inlined_call_operand.vmem [shape: f32[16,32], index: 0, kind: input, shape index: {}]   ;;  %s1339_s1 = inlined_call_operand.vmem [shape: f32[16,1], index: 1, kind: input, shape index: {}]   ;;  %s1340_s2 = inlined_call_operand.hbm [shape: f32[3,40,40], index: 2, kind: input, shape index: {}]   ;;  %s1341_s3 = inlined_call_operand.vmem [shape: f32[40,16], index: 3, kind: input, shape index: {}]   ;;  %s1342_s4 = inlined_call_operand.hbm [shape: f32[2,2], index: 4, kind: output, shape index: {}]  }
   0x1   :  { %10 = vsyncpa [#allocation4], 0  ;;  %s1185_s15 = smov [#allocation2]  }
   0x2   :  { %s20_s16 = sshll.u32 %s1185_s15, 4  ;;  %s21_s16 = int_to_ptr.vmem [resolvable:$true] %s20_s16 }
   0x3   :  { %s1149_s17 = scalar_lea.vmem %s21_s16, 1920  ;;  %p1154_p1 = scmp.lt.s32.totalorder %s21_s16, %s21_s16 }
   0x4   :  { %p1150_p0 = scmp.ne.s32.totalorder %s21_s16, %s1149_s17  ;;  %p1155_p2 = scmp.lt.s32.totalorder %s1149_s17, %s1149_s17 }
   0x6   :  { %p1156_p3 = por %p1155_p2, %p1154_p1 }
   0x8   :  { %p1157_p4 = pnand %p1156_p3, %p1150_p0 }
   0xa   :  { %1160 = shalt.err (!%p1157_p4)
}
   0xb   :  { %s1186_s18 = smov 128   ;;  %s1187_s19 = smov 8  }
   0xc   :  { %26 = dma.hbm_to_vmem [thread:$0]  %s1340_s2, 1920, %s21_s16, [#allocation3], %s1186_s18, %s1186_s18, %s1187_s19  }
   0xd   :  { %1181 = dma.done.wait [#allocation3], 1920  }
   0xe   :  { %1182 = vsyncadd [#allocation3], 4294965376  ;;  %v1188_v0 = vmov 0   ;;  %vm50_vm0 = vcmask 261120   ;;  %v44_v1 = vld [vmem:[#allocation2 + $0x18] sm:$0xff]  ;;  %v43_v2 = vld [vmem:[#allocation2 + $0x10] sm:$0xff]  ;;  %v46_v9 = vlaneseq }
   0xf   :  { %1117 = vset.pattern.permute.xlu1 %v1188_v0  ;;  %1118 = vset.pattern.permute.xlu0 %v1188_v0  ;;  %v39_v3 = vld [vmem:[%s1338_s0] sm:$0xff]  ;;  %v42_v4 = vld [vmem:[#allocation2 + $0x8] sm:$0xff]  ;;  %vm138_vm1 = vcmask 31744   ;;  %vm256_vm2 = vcmask 130048   ;;  %v343_v41 = vld [vmem:[#allocation2 + $0x38] sm:$0xff]  ;;  %vm734_vm3 = vcmask 15360  }
  0x10   :  { %1033 = vmatprep.subr.mxu0 %v44_v1  ;;  %1041 = vmatprep.mubr.msk.f32.mxu0 %vm50_vm0, %v39_v3  ;;  %v1231_v5 = vld [vmem:[%s1339_s1 + $0x8] sm:$0xff]  ;;  %v41_v6 = vld [vmem:[#allocation2] sm:$0xff]  ;;  %v47_v10 = vshrl.u32 %v46_v9, 7  ;;  %v342_v42 = vld [vmem:[#allocation2 + $0x30] sm:$0xff]  ;;  %s1191_s7 = smov 126   ;;  %s1192_s8 = smov 2  }
  0x11   :  { %1034 = vmatpush3.msra.mxu0 %v44_v1  ;;  %243 = vperm.xlu1 %1117, %v1231_v5   ;;  %v1237_v7 = vld [vmem:[%s1339_s1] sm:$0xff]  ;;  %v40_v8 = vld [vmem:[%s1338_s0 + $0x8] sm:$0xff]  ;;  %s1189_s0 = smov 124   ;;  %s1190_s1 = smov 120   ;;  %v719_v53 = vsub.f32 1.0, %v1231_v5  ;;  %vm1194_vm4 = vmmov 0  }
  0x12   :  { %1035 = vmatprep.subr.mxu0 %v43_v2  ;;  %v1244_v11 = vsub.s32 0, %v47_v10  ;;  %v45_v12 = vld [vmem:[#allocation2 + $0x20] sm:$0xff]  ;;  %v1271_v37 = vld [vmem:[%s1341_s3 + $0x8] sm:$0xff]  ;;  %v718_v55 = vsub.f32 1.0, %v1237_v7  ;;  %vm878_vm5 = vcmask 1043456   ;;  %s1195_s15 = smov [#allocation5]  }
  0x13   :  { %1036 = vmatpush3.msra.mxu0 %v43_v2  ;;  %v344_v26 = vld [vmem:[#allocation2 + $0x40] sm:$0xff]  ;;  %v341_v43 = vld [vmem:[#allocation2 + $0x28] sm:$0xff]  ;;  %v721_v57 = vmul.f32 1e+08, %v719_v53  ;;  %s960_s16 = sshll.u32 %s1195_s15, 4  ;;  %vm952_vm6 = vcmask 9216   ;;  %s961_s16 = int_to_ptr.vmem [resolvable:$true] %s960_s16 }
  0x14   :  { %1037 = vmatprep.subr.mxu0 %v42_v4  ;;  %v49_v14 = vrot.slane %v45_v12, %v1244_v11  ;;  %v1266_v35 = vld [vmem:[%s1341_s3] sm:$0xff]  ;;  %v345_v48 = vld [vmem:[#allocation2 + $0x48] sm:$0xff]  ;;  %v720_v59 = vmul.f32 1e+08, %v718_v55  ;;  %s1161_s17 = scalar_lea.vmem %s961_s16, 32  ;;  %p1166_p6 = scmp.lt.s32.totalorder %s961_s16, %s961_s16 }
  0x15   :  { %1038 = vmatpush3.msra.mxu0 %v42_v4  ;;  %238 = vperm.xlu1 %1117, %v1237_v7   ;;  %v349_v49 = vrot.slane %v345_v48, %v1244_v11  ;;  %v631_v0 = vld [vmem:[#allocation2 + $0x68] sm:$0xff]  ;;  %p1162_p5 = scmp.ne.s32.totalorder %s961_s16, %s1161_s17  ;;  %p1167_p7 = scmp.lt.s32.totalorder %s1161_s17, %s1161_s17 }
  0x16   :  { %1039 = vmatprep.subr.mxu0 %v41_v6 }
  0x17   :  { %1040 = vmatpush3.msra.mxu0 %v41_v6  ;;  %p1168_p8 = por %p1167_p7, %p1166_p6 }
  0x18   :  { %1042 = vmatmul.mubr.msk.f32.vlgmr.msra.gmra.mxu0 %vm50_vm0, %v40_v8 }
  0x19   :  { %p1169_p9 = pnand %p1168_p8, %p1162_p5 }
  0x8c   :  { %v1246_v13 = vpop.permute.xlu1 %243 }
  0x90   :  { %v1249_v18 = vpop.permute.xlu1 %238 }
  0xd8   :  { %v1043_v15 = vpop.f32.mrf.mxu0 }
  0xd9   :  { %v129_v16 = vadd.f32 %v1043_v15, %v49_v14  ;;  %v630_v15 = vld [vmem:[#allocation2 + $0x60] sm:$0xff] }
  0xda   :  { %v123_v17 = vpop.f32.mrf.mxu0 }
  0xdb   :  { %v124_v19 = vadd.f32 %v123_v17, %v49_v14  ;;  %136 = vrot.lane.b32.xlu0 %v129_v16, %s1189_s0  ;;  %v247_v21 = vmul.f32 %v1246_v13, %v129_v16  ;;  %v628_v17 = vld [vmem:[#allocation2 + $0x50] sm:$0xff] }
  0xdd   :  { %1048 = vmatprep.mubr.msk.f32.mxu1 %vm138_vm1, %v124_v19  ;;  %v246_v20 = vmul.f32 %v1249_v18, %v124_v19 }
  0xdf   :  { %134 = vrot.lane.b32.xlu0 %v124_v19, %s1189_s0  ;;  %250 = vrot.lane.b32.xlu1 %v246_v20, %s1190_s1 }
  0xe3   :  { %252 = vrot.lane.b32.xlu0 %v247_v21, %s1190_s1 }
 0x14d   :  { %v137_v22 = vpop.permute.xlu0 %136 }
 0x14e   :  { %1044 = vmatprep.subr.msk.mxu1 %vm138_vm1, %v137_v22 }
 0x14f   :  { %1045 = vmatpush3.xpose.msk.msra.mxu1 %vm138_vm1, %v137_v22 }
 0x151   :  { %v135_v23 = vpop.permute.xlu0 %134  ;;  %v251_v25 = vpop.permute.xlu1 %250 }
 0x152   :  { %1046 = vmatprep.subr.msk.mxu1 %vm138_vm1, %v135_v23 }
 0x153   :  { %1047 = vmatpush3.xpose.msk.msra.mxu1 %vm138_vm1, %v135_v23  ;;  %v632_v23 = vld [vmem:[#allocation2 + $0x70] sm:$0xff] }
 0x154   :  { %1058 = vmatprep.subr.mxu1 %v344_v26 }
 0x155   :  { %v253_v24 = vpop.permute.xlu0 %252 }
 0x156   :  { %1049 = vmatmul.mubr.msk.f32.vlgmr.msra.gmra.mxu1 %vm138_vm1, %v129_v16  ;;  %1051 = vmatprep.subr.mxu0 %v253_v24  ;;  %v629_v16 = vld [vmem:[#allocation2 + $0x58] sm:$0xff] }
 0x157   :  { %1052 = vmatpush3.msra.mxu0 %v253_v24  ;;  %1059 = vmatpush3.msra.mxu1 %v344_v26  ;;  %v636_v24 = vrot.slane %v632_v23, %v1244_v11 }
 0x158   :  { %1053 = vmatprep.subr.mxu0 %v251_v25  ;;  %1060 = vmatprep.subr.mxu1 %v343_v41 }
 0x159   :  { %1054 = vmatpush3.msra.mxu0 %v251_v25  ;;  %1061 = vmatpush3.msra.mxu1 %v343_v41 }
 0x15a   :  { %1062 = vmatprep.subr.mxu1 %v342_v42 }
 0x15b   :  { %1063 = vmatpush3.msra.mxu1 %v342_v42 }
 0x15c   :  { %1064 = vmatprep.subr.mxu1 %v341_v43 }
 0x15d   :  { %1065 = vmatpush3.msra.mxu1 %v341_v43 }
 0x216   :  { %v1050_v27 = vpop.f32.mrf.mxu1 }
 0x217   :  { %v976_v28 = vmul.f32 -1.442695, %v1050_v27 }
 0x218   :  { %v213_v29 = vpop.f32.mrf.mxu1 }
 0x219   :  { %1119 = vpow2.f32 %v976_v28  ;;  %v975_v30 = vmul.f32 -1.442695, %v213_v29 }
 0x21b   :  { %1121 = vpow2.f32 %v975_v30 }
 0x226   :  { %v1120_v31 = vpop.eup %1119 }
 0x227   :  { %v229_v32 = vadd.f32 1.0, %v1120_v31 }
 0x228   :  { %v1122_v33 = vpop.eup %1121 }
 0x229   :  { %v228_v34 = vadd.f32 1.0, %v1122_v33  ;;  %1123 = vrcp.f32 %v229_v32 }
 0x22b   :  { %1125 = vrcp.f32 %v228_v34 }
 0x236   :  { %v1124_v36 = vpop.eup %1123 }
 0x237   :  { %v235_v40 = vmul.f32 %v1124_v36, %v1271_v37 }
 0x238   :  { %v1126_v38 = vpop.eup %1125 }
 0x239   :  { %v234_v39 = vmul.f32 %v1126_v38, %v1266_v35 }
 0x23b   :  { %1055 = vmatprep.mubr.msk.f32.mxu0 %vm256_vm2, %v234_v39 }
 0x23c   :  { %1056 = vmatmul.mubr.msk.f32.vlgmr.msra.gmra.mxu0 %vm256_vm2, %v235_v40 }
 0x2fc   :  { %v1057_v44 = vpop.f32.mrf.mxu0 }
 0x2fd   :  { %v339_v47 = vmul.f32 %v1057_v44, %v1246_v13 }
 0x2fe   :  { %v329_v45 = vpop.f32.mrf.mxu0 }
 0x2ff   :  { %v338_v46 = vmul.f32 %v329_v45, %v1249_v18 }
 0x301   :  { %1066 = vmatprep.mubr.msk.f32.mxu1 %vm50_vm0, %v338_v46 }
 0x302   :  { %1067 = vmatmul.mubr.msk.f32.vlgmr.msra.gmra.mxu1 %vm50_vm0, %v339_v47 }
 0x3c2   :  { %v1068_v50 = vpop.f32.mrf.mxu1 }
 0x3c3   :  { %v428_v51 = vadd.f32 %v1068_v50, %v349_v49 }
 0x3c4   :  { %v422_v52 = vpop.f32.mrf.mxu1 }
 0x3c5   :  { %v423_v54 = vadd.f32 %v422_v52, %v349_v49  ;;  %435 = vrot.lane.b32.xlu0 %v428_v51, %s1189_s0  ;;  %v535_v56 = vmul.f32 %v428_v51, %v1246_v13 }
 0x3c7   :  { %433 = vrot.lane.b32.xlu1 %v423_v54, %s1189_s0  ;;  %1073 = vmatprep.mubr.msk.f32.mxu0 %vm138_vm1, %v423_v54  ;;  %v534_v58 = vmul.f32 %v423_v54, %v1249_v18 }
 0x3c9   :  { %540 = vrot.lane.b32.xlu0 %v535_v56, %s1190_s1 }
 0x3cb   :  { %538 = vrot.lane.b32.xlu1 %v534_v58, %s1190_s1 }
 0x3cd   :  { %729 = vperm.xlu0 %1118, %v721_v57  }
 0x3cf   :  { %724 = vperm.xlu1 %1117, %v720_v59  }
 0x437   :  { %v436_v60 = vpop.permute.xlu0 %435 }
 0x438   :  { %1069 = vmatprep.subr.msk.mxu0 %vm138_vm1, %v436_v60 }
 0x439   :  { %1070 = vmatpush3.xpose.msk.msra.mxu0 %vm138_vm1, %v436_v60  ;;  %v434_v61 = vpop.permute.xlu1 %433 }
 0x43a   :  { %1071 = vmatprep.subr.msk.mxu0 %vm138_vm1, %v434_v61 }
 0x43b   :  { %v541_v62 = vpop.permute.xlu0 %540 }
 0x43c   :  { %1076 = vmatprep.subr.mxu1 %v541_v62 }
 0x43d   :  { %1072 = vmatpush3.xpose.msk.msra.mxu0 %vm138_vm1, %v434_v61  ;;  %1077 = vmatpush3.msra.mxu1 %v541_v62  ;;  %v539_v63 = vpop.permute.xlu1 %538 }
 0x43e   :  { %1078 = vmatprep.subr.mxu1 %v539_v63  ;;  %1083 = vmatprep.subr.mxu0 %v631_v0 }
 0x43f   :  { %1079 = vmatpush3.msra.mxu1 %v539_v63  ;;  %v36_v63 = vld [vmem:[%s1341_s3 + $0x10] sm:$0xff] }
 0x440   :  { %1074 = vmatmul.mubr.msk.f32.vlgmr.msra.gmra.mxu0 %vm138_vm1, %v428_v51  ;;  %v1193_v51 = vmov 0.0  }
 0x441   :  { %1084 = vmatpush3.msra.mxu0 %v631_v0  ;;  %1094 = vmatprep.subr.mxu1 %v1193_v51 }
 0x442   :  { %1085 = vmatprep.subr.mxu0 %v630_v15 }
 0x443   :  { %1086 = vmatpush3.msra.mxu0 %v630_v15 }
 0x444   :  { %1087 = vmatprep.subr.mxu0 %v629_v16 }
 0x445   :  { %1088 = vmatpush3.msra.mxu0 %v629_v16 }
 0x446   :  { %1089 = vmatprep.subr.mxu0 %v628_v17 }
 0x447   :  { %1090 = vmatpush3.msra.mxu0 %v628_v17 }
 0x448   :  { %v730_v26 = vpop.permute.xlu0 %729 }
 0x500   :  { %v1075_v1 = vpop.f32.mrf.mxu0 }
 0x501   :  { %v986_v2 = vmul.f32 -1.442695, %v1075_v1 }
 0x502   :  { %v511_v3 = vpop.f32.mrf.mxu0 }
 0x503   :  { %1127 = vpow2.f32 %v986_v2  ;;  %v985_v4 = vmul.f32 -1.442695, %v511_v3 }
 0x505   :  { %1129 = vpow2.f32 %v985_v4 }
 0x510   :  { %v1128_v5 = vpop.eup %1127 }
 0x511   :  { %v527_v6 = vadd.f32 1.0, %v1128_v5  ;;  %v37_v5 = vld [vmem:[%s1341_s3 + $0x18] sm:$0xff] }
 0x512   :  { %v1130_v7 = vpop.eup %1129 }
 0x513   :  { %v526_v8 = vadd.f32 1.0, %v1130_v7  ;;  %1131 = vrcp.f32 %v527_v6 }
 0x515   :  { %1133 = vrcp.f32 %v526_v8 }
 0x520   :  { %v1132_v9 = vpop.eup %1131 }
 0x521   :  { %v533_v14 = vmul.f32 %v1132_v9, %v1271_v37 }
 0x522   :  { %v1134_v10 = vpop.eup %1133 }
 0x523   :  { %v532_v12 = vmul.f32 %v1134_v10, %v1266_v35  ;;  %v38_v10 = vld [vmem:[%s1341_s3 + $0x20] sm:$0xff] }
 0x525   :  { %1080 = vmatprep.mubr.msk.f32.mxu1 %vm256_vm2, %v532_v12  ;;  %v872_v12 = vrot.slane %v38_v10, %v1244_v11 }
 0x526   :  { %1081 = vmatmul.mubr.msk.f32.vlgmr.msra.gmra.mxu1 %vm256_vm2, %v533_v14 }
 0x527   :  { %1098 = vmatprep.mubr.msk.f32.mxu1 %vm1194_vm4, %v1193_v51 }
 0x5e6   :  { %v1082_v19 = vpop.f32.mrf.mxu1 }
 0x5e7   :  { %v626_v22 = vmul.f32 %v1082_v19, %v1246_v13 }
 0x5e8   :  { %v616_v20 = vpop.f32.mrf.mxu1 }
 0x5e9   :  { %v625_v21 = vmul.f32 %v616_v20, %v1249_v18  ;;  %v725_v18 = vpop.permute.xlu1 %724 }
 0x5eb   :  { %1091 = vmatprep.mubr.msk.f32.mxu0 %vm50_vm0, %v625_v21 }
 0x5ec   :  { %1092 = vmatmul.mubr.msk.f32.vlgmr.msra.gmra.mxu0 %vm50_vm0, %v626_v22 }
 0x6ac   :  { %v1093_v25 = vpop.f32.mrf.mxu0 }
 0x6ad   :  { %v715_v27 = vadd.f32 %v1093_v25, %v636_v24 }
 0x6ae   :  { %v709_v28 = vpop.f32.mrf.mxu0 }
 0x6af   :  { %v733_v29 = vsub.f32 %v715_v27, %v730_v26  ;;  %v710_v30 = vadd.f32 %v709_v28, %v636_v24  ;;  %769 = vrot.lane.b32.xlu0 %v715_v27, %s1191_s7 }
 0x6b1   :  { %v745_v13 = vsel %vm734_vm3, %v733_v29, -inf  ;;  %v732_v31 = vsub.f32 %v710_v30, %v725_v18 }
 0x6b2   :  { %v746_v32 = vrot.slane %v745_v13, 4 }
 0x6b3   :  { %v735_v33 = vsel %vm734_vm3, %v732_v31, -inf  ;;  %767 = vrot.lane.b32.xlu0 %v710_v30, %s1191_s7 }
 0x6b4   :  { %v747_v34 = vmax.f32 %v745_v13, %v746_v32  ;;  %v736_v35 = vrot.slane %v735_v33, 4 }
 0x6b6   :  { %v748_v36 = vrot.slane %v747_v34, 2  ;;  %v737_v37 = vmax.f32 %v735_v33, %v736_v35 }
 0x6b8   :  { %v749_v38 = vmax.f32 %v747_v34, %v748_v36  ;;  %v738_v39 = vrot.slane %v737_v37, 2 }
 0x6ba   :  { %v750_v40 = vrot.slane %v749_v38, 1  ;;  %v739_v41 = vmax.f32 %v737_v37, %v738_v39 }
 0x6bc   :  { %v751_v42 = vmax.f32 %v749_v38, %v750_v40  ;;  %v740_v43 = vrot.slane %v739_v41, 1 }
 0x6be   :  { %v752_v44 = vsub.f32 %v733_v29, %v751_v42  ;;  %v741_v45 = vmax.f32 %v739_v41, %v740_v43 }
 0x6c0   :  { %v753_v46 = vmul.f32 1.442695, %v752_v44  ;;  %v742_v47 = vsub.f32 %v732_v31, %v741_v45 }
 0x6c2   :  { %1135 = vpow2.f32 %v753_v46  ;;  %v743_v48 = vmul.f32 1.442695, %v742_v47 }
 0x6c4   :  { %1137 = vpow2.f32 %v743_v48 }
 0x6cf   :  { %v1136_v49 = vpop.eup %1135 }
 0x6d0   :  { %759 = vrot.lane.b32.xlu1 %v1136_v49, %s1192_s8 }
 0x6d1   :  { %v1138_v50 = vpop.eup %1137 }
 0x6d4   :  { %757 = vrot.lane.b32.xlu1 %v1138_v50, %s1192_s8 }
 0x721   :  { %v770_v52 = vpop.permute.xlu0 %769 }
 0x725   :  { %v768_v57 = vpop.permute.xlu0 %767 }
 0x742   :  { %v760_v53 = vpop.permute.xlu1 %759 }
 0x743   :  { %v764_v54 = vsel %vm734_vm3, %v1136_v49, %v760_v53 }
 0x744   :  { %v774_v55 = vmul.f32 %v770_v52, %v764_v54 }
 0x746   :  { %779 = vrot.lane.b32.xlu1 %v774_v55, %s1192_s8  ;;  %v758_v56 = vpop.permute.xlu1 %757 }
 0x747   :  { %v763_v58 = vsel %vm734_vm3, %v1138_v50, %v758_v56 }
 0x748   :  { %v773_v59 = vmul.f32 %v768_v57, %v763_v58 }
 0x74a   :  { %777 = vrot.lane.b32.xlu0 %v773_v59, %s1192_s8 }
 0x7b8   :  { %v780_v60 = vpop.permute.xlu1 %779 }
 0x7b9   :  { %v784_v61 = vsel %vm734_vm3, %v1136_v49, %v780_v60 }
 0x7ba   :  { %1095 = vmatpush3.msra.mxu1 %v784_v61 }
 0x7bb   :  { %1096 = vmatprep.subr.mxu1 %v1193_v51 }
 0x7bc   :  { %v778_v62 = vpop.permute.xlu0 %777 }
 0x7bd   :  { %v783_v0 = vsel %vm734_vm3, %v1138_v50, %v778_v62 }
 0x7be   :  { %1097 = vmatpush3.msra.mxu1 %v783_v0 }
 0x7bf   :  { %1099 = vmatmul.mubr.msk.f32.vlgmr.msra.gmra.mxu1 %vm256_vm2, %v36_v63  ;;  %1101 = vmatprep.subr.mxu1 %v1193_v51 }
 0x7c0   :  { %1103 = vmatprep.mubr.msk.f32.mxu1 %vm1194_vm4, %v1193_v51  ;;  %1102 = vmatpush3.msk.msra.mxu1 %vm878_vm5, %v37_v5 }
 0x87f   :  { %v854_v1 = vpop.f32.mrf.mxu1 }
 0x880   :  { %859 = vrot.lane.b32.xlu1 %v854_v1, %s1192_s8 }
 0x881   :  { %v1100_v2 = vpop.f32.mrf.mxu1 }
 0x8f2   :  { %v860_v3 = vpop.permute.xlu1 %859 }
 0x8f3   :  { %v862_v4 = vsel %vm734_vm3, %v854_v1, %v860_v3 }
 0x8f4   :  { %864 = vrot.lane.b32.xlu0 %v862_v4, %s1192_s8 }
 0x966   :  { %v865_v6 = vpop.permute.xlu0 %864 }
 0x967   :  { %1139 = vrcp.f32 %v865_v6 }
 0x974   :  { %v1140_v7 = vpop.eup %1139 }
 0x975   :  { %v868_v8 = vmul.f32 %v1140_v7, %v854_v1 }
 0x977   :  { %874 = vrot.lane.b32.xlu1 %v868_v8, %s1191_s7 }
 0x9e9   :  { %v875_v9 = vpop.permute.xlu1 %874 }
 0x9ea   :  { %1104 = vmatmul.mubr.msk.f32.vlgmr.msra.gmra.mxu1 %vm138_vm1, %v875_v9 }
 0xaaa   :  { %v948_v14 = vpop.f32.mrf.mxu1 }
 0xaab   :  { %v949_v15 = vadd.f32 %v948_v14, %v872_v12 }
 0xaac   :  { %v1105_v16 = vpop.f32.mrf.mxu1 }
 0xaad   :  { %953 = vst.msk [vmem:[#allocation5] sm:$0x3] %vm952_vm6, %v949_v15 }
 0xaae   :  { %1172 = shalt.err (!%p1169_p9)
}
 0xaaf   :  { %963 = dma.vmem_to_hbm [thread:$0]  %s961_s16, 32, %s1342_s4, [#allocation4]  }
 0xab0   :  { %1183 = dma.done.wait [#allocation4], 32  }
 0xab1   :  { %1184 = vsyncadd [#allocation4], 4294967264 }
 0xab2   :  { %967 = vsyncpa [#allocation3], 1 }
 0xab3   :  { %968 = vsyncpa [#allocation4], 1 }

</bundles_post_ra>
